<compile_context>
chip_gen: v7x
topology: tpu7x:2x2x1
jax: 0.10.0
libtpu: 0.0.40
codegen_flags: <defaults>
</compile_context>

<pallas_src>
import jax
import jax.numpy as jnp
from jax.experimental import pallas as pl
from jax.experimental.pallas import tpu as pltpu


def dkvmn_kernel(q_ref, qa_ref, key_t_ref, mv_init_ref,
                 we_t_ref, be_ref, wa_t_ref, ba_ref,
                 out_ref, mem_scratch):
    """One (batch-tile, seq-chunk) grid step.

    q_ref       : (B_TILE, T_CHUNK, Dk)
    qa_ref      : (B_TILE, T_CHUNK, Dv)
    key_t_ref   : (Dk, M)     memory_key, pre-transposed in the wrapper
    mv_init_ref : (M, Dv)     init_memory_value
    we_t_ref    : (Dv, Dv)    erase weight, pre-transposed
    be_ref      : (1, Dv)     erase bias
    wa_t_ref    : (Dv, Dv)    add weight, pre-transposed
    ba_ref      : (1, Dv)     add bias
    out_ref     : (B_TILE, T_CHUNK * Dv)   lane-dense output slab
    mem_scratch : (B_TILE, M, Dv)          persistent value memory
    """
    bt, tc, dk = q_ref.shape
    dv = qa_ref.shape[2]

    # New batch tile (chunk index 0) -> reset value memory to its initial state.
    @pl.when(pl.program_id(1) == 0)
    def _():
        mem_scratch[...] = jnp.broadcast_to(
            mv_init_ref[...][None, :, :], mem_scratch.shape)

    # ---- Phase 1: hoisted batched GEMMs + transcendentals for the chunk ----
    q2 = q_ref[...].reshape(bt * tc, dk)                       # (B*T, Dk)
    qa2 = qa_ref[...].reshape(bt * tc, dv)                     # (B*T, Dv)

    scores = jnp.dot(q2, key_t_ref[...], preferred_element_type=jnp.float32)
    scores = scores - jnp.max(scores, axis=1, keepdims=True)
    e = jnp.exp(scores)
    w2 = e * pl.reciprocal(jnp.sum(e, axis=1, keepdims=True), approx=False)
    w_all = w2.reshape(bt, tc, -1)                             # (B, T, M)

    erase_all = jax.nn.sigmoid(
        jnp.dot(qa2, we_t_ref[...], preferred_element_type=jnp.float32)
        + be_ref[...]).reshape(bt, tc, dv)                     # (B, T, Dv)
    add_all = jnp.tanh(
        jnp.dot(qa2, wa_t_ref[...], preferred_element_type=jnp.float32)
        + ba_ref[...]).reshape(bt, tc, dv)                     # (B, T, Dv)

    # ---- Phase 2: serial recurrence — pure elementwise VPU/XLU work ----
    mem = mem_scratch[...]                                     # (B, M, Dv)
    reads = []
    for i in range(tc):                                        # trace-time unroll
        w_i = w_all[:, i, :]                                   # (B, M)
        # read BEFORE write (matches the reference loop order)
        reads.append(jnp.sum(w_i[:, :, None] * mem, axis=1))   # (B, Dv)
        a_i = add_all[:, i, :][:, None, :]                     # (B, 1, Dv)
        e_i = erase_all[:, i, :][:, None, :]                   # (B, 1, Dv)
        mem = mem + w_i[:, :, None] * (a_i - e_i * mem)        # fused erase+add
    mem_scratch[...] = mem

    # Single dense (B, T*Dv) store — lane-dense writeback.
    out_ref[...] = jnp.concatenate(reads, axis=1).astype(out_ref.dtype)


def _pick_seq_chunk(S, Dv):
    """Chunk must divide S, be a multiple of 8 and yield >=128-lane out blocks."""
    for cand in (32, 16, 8):
        if S % cand == 0 and (cand * Dv) % 128 == 0:
            return cand
    return S   # fallback: one chunk == full sequence (always a legal block)


def dkvmn_forward(q_data, q_embed, qa_embed, params):
    """Returns all_read_value_content with shape (B, S, Dv)."""
    del q_data  # if_memory_write is computed but unused by DKVMN.write in the reference
    B, S, Dk = q_embed.shape
    Dv = qa_embed.shape[2]
    M = params["memory_key"].shape[0]

    T_CHUNK = _pick_seq_chunk(S, Dv)
    B_TILE = B                       # whole batch per tile at these sizes
    num_b = B // B_TILE
    num_c = S // T_CHUNK

    f32 = jnp.float32
    # Keep original (B, S, D) layout — no wrapper transposes of the activations.
    q = q_embed.astype(f32)
    qa = qa_embed.astype(f32)
    # Transpose the small weights once, outside the recurrent kernel.
    key_t = params["memory_key"].astype(f32).T                 # (Dk, M)
    we_t = params["erase_w"].astype(f32).T                     # (Dv, Dv)
    wa_t = params["add_w"].astype(f32).T                       # (Dv, Dv)
    be = params["erase_b"].reshape(1, Dv).astype(f32)
    ba = params["add_b"].reshape(1, Dv).astype(f32)
    mv0 = params["init_memory_value"].astype(f32)              # (M, Dv)

    out_flat = pl.pallas_call(
        dkvmn_kernel,
        out_shape=jax.ShapeDtypeStruct((B, S * Dv), f32),
        grid_spec=pltpu.PrefetchScalarGridSpec(
            num_scalar_prefetch=0,
            grid=(num_b, num_c),
            in_specs=[
                pl.BlockSpec((B_TILE, T_CHUNK, Dk), lambda b, c: (b, c, 0)),  # q chunk
                pl.BlockSpec((B_TILE, T_CHUNK, Dv), lambda b, c: (b, c, 0)),  # qa chunk
                pl.BlockSpec((Dk, M), lambda b, c: (0, 0)),                   # key^T
                pl.BlockSpec((M, Dv), lambda b, c: (0, 0)),                   # init mem value
                pl.BlockSpec((Dv, Dv), lambda b, c: (0, 0)),                  # erase W^T
                pl.BlockSpec((1, Dv), lambda b, c: (0, 0)),                   # erase b
                pl.BlockSpec((Dv, Dv), lambda b, c: (0, 0)),                  # add W^T
                pl.BlockSpec((1, Dv), lambda b, c: (0, 0)),                   # add b
            ],
            out_specs=pl.BlockSpec((B_TILE, T_CHUNK * Dv), lambda b, c: (b, c)),
            scratch_shapes=[pltpu.VMEM((B_TILE, M, Dv), f32)],
        ),
        compiler_params=pltpu.CompilerParams(
            dimension_semantics=("parallel", "arbitrary")),  # batch parallel, seq ordered
    )(q, qa, key_t, mv0, we_t, be, wa_t, ba)

    return out_flat.reshape(B, S, Dv)   # contiguous reshape — free


def dkvmn_forward_ref(q_embed, qa_embed, params):
    """Pure-JAX reference mirroring the PyTorch loop."""
    B, S, Dk = q_embed.shape
    key = params["memory_key"]
    mem = jnp.broadcast_to(params["init_memory_value"][None],
                           (B,) + params["init_memory_value"].shape)
    outs = []
    for i in range(S):
        q = q_embed[:, i, :]
        qa = qa_embed[:, i, :]
        w = jax.nn.softmax(q @ key.T, axis=1)
        outs.append(jnp.sum(w[:, :, None] * mem, axis=1))
        erase = jax.nn.sigmoid(qa @ params["erase_w"].T + params["erase_b"])
        add = jnp.tanh(qa @ params["add_w"].T + params["add_b"])
        mem = mem * (1.0 - erase[:, None, :] * w[:, :, None]) \
              + add[:, None, :] * w[:, :, None]
    return jnp.stack(outs, axis=1)


def init_params(key, memory_size, q_embed_dim, qa_embed_dim):
    """Deterministic synthetic parameters (kaiming-style normals, zero biases)."""
    ks = jax.random.split(key, 4)

    def kaiming(k, shape):
        fan_in = shape[-1]
        return jax.random.normal(k, shape, jnp.float32) * jnp.sqrt(2.0 / fan_in)

    return {
        "memory_key": kaiming(ks[0], (memory_size, q_embed_dim)),
        "init_memory_value": kaiming(ks[1], (memory_size, qa_embed_dim)),
        "erase_w": kaiming(ks[2], (qa_embed_dim, qa_embed_dim)),
        "erase_b": jnp.zeros((qa_embed_dim,), jnp.float32),
        "add_w": kaiming(ks[3], (qa_embed_dim, qa_embed_dim)),
        "add_b": jnp.zeros((qa_embed_dim,), jnp.float32),
    }


if __name__ == "__main__":
    B, S = 2, 8
    memory_size = 16
    q_embed_dim = 32     # memory_key_state_dim
    qa_embed_dim = 32    # memory_value_state_dim
    n_question = 10

    root = jax.random.PRNGKey(0)
    kp, kq, kqa, kd = jax.random.split(root, 4)

    params = init_params(kp, memory_size, q_embed_dim, qa_embed_dim)
    q_data = jax.random.randint(kd, (B, S), 0, n_question + 1, jnp.int32)
    q_embed = jax.random.normal(kq, (B, S, q_embed_dim), jnp.float32)
    qa_embed = jax.random.normal(kqa, (B, S, qa_embed_dim), jnp.float32)

    out = dkvmn_forward(q_data, q_embed, qa_embed, params)
    out = jax.block_until_ready(out)

    ref = dkvmn_forward_ref(q_embed, qa_embed, params)
    assert out.shape == (B, S, qa_embed_dim)
    assert jnp.allclose(out, ref, atol=1e-4, rtol=1e-4), "mismatch vs reference"

    print("KERNEL_OK")
</pallas_src>

<mosaic_0001>
module attributes {stable_mosaic.version = 11 : i64} {
  func.func @dkvmn_kernel(%arg0: i32, %arg1: i32, %arg2: memref<2x8x32xf32, #tpu.memory_space<vmem>>, %arg3: memref<2x8x32xf32, #tpu.memory_space<vmem>>, %arg4: memref<32x16xf32, #tpu.memory_space<vmem>>, %arg5: memref<16x32xf32, #tpu.memory_space<vmem>>, %arg6: memref<32x32xf32, #tpu.memory_space<vmem>>, %arg7: memref<1x32xf32, #tpu.memory_space<vmem>>, %arg8: memref<32x32xf32, #tpu.memory_space<vmem>>, %arg9: memref<1x32xf32, #tpu.memory_space<vmem>>, %arg10: memref<2x256xf32, #tpu.memory_space<vmem>>, %arg11: memref<2x16x32xf32, #tpu.memory_space<vmem>>) attributes {dimension_semantics = [#tpu.dimension_semantics<parallel>, #tpu.dimension_semantics<arbitrary>], iteration_bounds = array<i64: 1, 1>, scalar_prefetch = 0 : i64, scratch_operands = 1 : i64, tpu.core_type = #tpu.core_type<tc>, window_params = [{transform_indices = @transform_0, window_bounds = array<i64: 2, 8, 32>}, {transform_indices = @transform_1, window_bounds = array<i64: 2, 8, 32>}, {pipeline_mode = #tpu.pipeline_mode<synchronous>, transform_indices = @transform_2, window_bounds = array<i64: 32, 16>}, {pipeline_mode = #tpu.pipeline_mode<synchronous>, transform_indices = @transform_3, window_bounds = array<i64: 16, 32>}, {pipeline_mode = #tpu.pipeline_mode<synchronous>, transform_indices = @transform_4, window_bounds = array<i64: 32, 32>}, {pipeline_mode = #tpu.pipeline_mode<synchronous>, transform_indices = @transform_5, window_bounds = array<i64: 1, 32>}, {pipeline_mode = #tpu.pipeline_mode<synchronous>, transform_indices = @transform_6, window_bounds = array<i64: 32, 32>}, {pipeline_mode = #tpu.pipeline_mode<synchronous>, transform_indices = @transform_7, window_bounds = array<i64: 1, 32>}, {transform_indices = @transform_8, window_bounds = array<i64: 2, 256>}]} {
    %c0_i32 = arith.constant 0 : i32
    %0 = arith.cmpi eq, %arg1, %c0_i32 : i32
    %1 = arith.extui %0 : i1 to i32
    %c0_i32_0 = arith.constant 0 : i32
    %2 = arith.cmpi ne, %1, %c0_i32_0 : i32
    scf.if %2 {
      %c0_37 = arith.constant 0 : index
      %c0_38 = arith.constant 0 : index
      %202 = vector.load %arg5[%c0_37, %c0_38] : memref<16x32xf32, #tpu.memory_space<vmem>>, vector<16x32xf32>
      %203 = vector.shape_cast %202 : vector<16x32xf32> to vector<1x16x32xf32>
      %204 = vector.shape_cast %203 : vector<1x16x32xf32> to vector<1x16x32xf32>
      %205 = vector.broadcast %204 : vector<1x16x32xf32> to vector<2x16x32xf32>
      %c0_39 = arith.constant 0 : index
      %c0_40 = arith.constant 0 : index
      %c0_41 = arith.constant 0 : index
      %206 = vector.load %arg11[%c0_39, %c0_40, %c0_41] : memref<2x16x32xf32, #tpu.memory_space<vmem>>, vector<2x16x32xf32>
      tpu.vector_store %arg11[%c0_39, %c0_40, %c0_41], %205 {strides = array<i32>} : memref<2x16x32xf32, #tpu.memory_space<vmem>>, vector<2x16x32xf32>,
    } else {
    }
    %c0 = arith.constant 0 : index
    %c0_1 = arith.constant 0 : index
    %c0_2 = arith.constant 0 : index
    %3 = vector.load %arg2[%c0, %c0_1, %c0_2] : memref<2x8x32xf32, #tpu.memory_space<vmem>>, vector<2x8x32xf32>
    %4 = vector.shape_cast %3 : vector<2x8x32xf32> to vector<16x32xf32>
    %c0_3 = arith.constant 0 : index
    %c0_4 = arith.constant 0 : index
    %c0_5 = arith.constant 0 : index
    %5 = vector.load %arg3[%c0_3, %c0_4, %c0_5] : memref<2x8x32xf32, #tpu.memory_space<vmem>>, vector<2x8x32xf32>
    %6 = vector.shape_cast %5 : vector<2x8x32xf32> to vector<16x32xf32>
    %c0_6 = arith.constant 0 : index
    %c0_7 = arith.constant 0 : index
    %7 = vector.load %arg4[%c0_6, %c0_7] : memref<32x16xf32, #tpu.memory_space<vmem>>, vector<32x16xf32>
    %cst = arith.constant dense<0.000000e+00> : vector<16x16xf32>
    %8 = tpu.matmul %4, %7, %cst {dimension_numbers = #tpu.dot_dimension_numbers<[1], [0], [0], [1], [0, 0, 1, 1], [], []>} : vector<16x32xf32>, vector<32x16xf32>, vector<16x16xf32> -> vector<16x16xf32>
    %cst_8 = arith.constant dense<0xFF800000> : vector<16xf32>
    %9 = vector.multi_reduction <maximumf>, %8, %cst_8 [1] : vector<16x16xf32> to vector<16xf32>
    %10 = vector.shape_cast %9 : vector<16xf32> to vector<16x1xf32>
    %11 = vector.broadcast %10 : vector<16x1xf32> to vector<16x16xf32>
    %12 = arith.subf %8, %11 : vector<16x16xf32>
    %13 = math.exp %12 : vector<16x16xf32>
    %cst_9 = arith.constant dense<0.000000e+00> : vector<16xf32>
    %14 = vector.multi_reduction <add>, %13, %cst_9 [1] : vector<16x16xf32> to vector<16xf32>
    %15 = vector.shape_cast %14 : vector<16xf32> to vector<16x1xf32>
    %16 = tpu.reciprocal %15 : vector<16x1xf32> -> vector<16x1xf32>
    %17 = vector.broadcast %16 : vector<16x1xf32> to vector<16x16xf32>
    %18 = arith.mulf %13, %17 : vector<16x16xf32>
    %19 = vector.shape_cast %18 : vector<16x16xf32> to vector<2x8x16xf32>
    %c0_10 = arith.constant 0 : index
    %c0_11 = arith.constant 0 : index
    %20 = vector.load %arg6[%c0_10, %c0_11] : memref<32x32xf32, #tpu.memory_space<vmem>>, vector<32x32xf32>
    %cst_12 = arith.constant dense<0.000000e+00> : vector<16x32xf32>
    %21 = tpu.matmul %6, %20, %cst_12 {dimension_numbers = #tpu.dot_dimension_numbers<[1], [0], [0], [1], [0, 0, 1, 1], [], []>} : vector<16x32xf32>, vector<32x32xf32>, vector<16x32xf32> -> vector<16x32xf32>
    %c0_13 = arith.constant 0 : index
    %c0_14 = arith.constant 0 : index
    %22 = vector.load %arg7[%c0_13, %c0_14] : memref<1x32xf32, #tpu.memory_space<vmem>>, vector<1x32xf32>
    %23 = vector.broadcast %22 : vector<1x32xf32> to vector<16x32xf32>
    %24 = arith.addf %21, %23 : vector<16x32xf32>
    %25 = arith.negf %24 : vector<16x32xf32>
    %26 = math.exp %25 : vector<16x32xf32>
    %cst_15 = arith.constant 1.000000e+00 : f32
    %27 = vector.broadcast %cst_15 : f32 to vector<16x32xf32>
    %28 = arith.addf %27, %26 : vector<16x32xf32>
    %29 = arith.divf %27, %28 : vector<16x32xf32>
    %30 = vector.shape_cast %29 : vector<16x32xf32> to vector<2x8x32xf32>
    %c0_16 = arith.constant 0 : index
    %c0_17 = arith.constant 0 : index
    %31 = vector.load %arg8[%c0_16, %c0_17] : memref<32x32xf32, #tpu.memory_space<vmem>>, vector<32x32xf32>
    %cst_18 = arith.constant dense<0.000000e+00> : vector<16x32xf32>
    %32 = tpu.matmul %6, %31, %cst_18 {dimension_numbers = #tpu.dot_dimension_numbers<[1], [0], [0], [1], [0, 0, 1, 1], [], []>} : vector<16x32xf32>, vector<32x32xf32>, vector<16x32xf32> -> vector<16x32xf32>
    %c0_19 = arith.constant 0 : index
    %c0_20 = arith.constant 0 : index
    %33 = vector.load %arg9[%c0_19, %c0_20] : memref<1x32xf32, #tpu.memory_space<vmem>>, vector<1x32xf32>
    %34 = vector.broadcast %33 : vector<1x32xf32> to vector<16x32xf32>
    %35 = arith.addf %32, %34 : vector<16x32xf32>
    %36 = math.tanh %35 : vector<16x32xf32>
    %37 = vector.shape_cast %36 : vector<16x32xf32> to vector<2x8x32xf32>
    %c0_21 = arith.constant 0 : index
    %c0_22 = arith.constant 0 : index
    %c0_23 = arith.constant 0 : index
    %38 = vector.load %arg11[%c0_21, %c0_22, %c0_23] : memref<2x16x32xf32, #tpu.memory_space<vmem>>, vector<2x16x32xf32>
    %39 = vector.extract_strided_slice %19 {offsets = [0, 0, 0], sizes = [2, 1, 16], strides = [1, 1, 1]} : vector<2x8x16xf32> to vector<2x1x16xf32>
    %40 = vector.shape_cast %39 : vector<2x1x16xf32> to vector<2x16xf32>
    %41 = vector.shape_cast %40 : vector<2x16xf32> to vector<2x16x1xf32>
    %42 = vector.broadcast %41 : vector<2x16x1xf32> to vector<2x16x32xf32>
    %43 = arith.mulf %42, %38 : vector<2x16x32xf32>
    %cst_24 = arith.constant dense<0.000000e+00> : vector<2x32xf32>
    %44 = vector.multi_reduction <add>, %43, %cst_24 [1] : vector<2x16x32xf32> to vector<2x32xf32>
    %45 = vector.extract_strided_slice %37 {offsets = [0, 0, 0], sizes = [2, 1, 32], strides = [1, 1, 1]} : vector<2x8x32xf32> to vector<2x1x32xf32>
    %46 = vector.shape_cast %45 : vector<2x1x32xf32> to vector<2x32xf32>
    %47 = vector.shape_cast %46 : vector<2x32xf32> to vector<2x1x32xf32>
    %48 = vector.extract_strided_slice %30 {offsets = [0, 0, 0], sizes = [2, 1, 32], strides = [1, 1, 1]} : vector<2x8x32xf32> to vector<2x1x32xf32>
    %49 = vector.shape_cast %48 : vector<2x1x32xf32> to vector<2x32xf32>
    %50 = vector.shape_cast %49 : vector<2x32xf32> to vector<2x1x32xf32>
    %51 = vector.shape_cast %40 : vector<2x16xf32> to vector<2x16x1xf32>
    %52 = vector.broadcast %50 : vector<2x1x32xf32> to vector<2x16x32xf32>
    %53 = arith.mulf %52, %38 : vector<2x16x32xf32>
    %54 = vector.broadcast %47 : vector<2x1x32xf32> to vector<2x16x32xf32>
    %55 = arith.subf %54, %53 : vector<2x16x32xf32>
    %56 = vector.broadcast %51 : vector<2x16x1xf32> to vector<2x16x32xf32>
    %57 = arith.mulf %56, %55 : vector<2x16x32xf32>
    %58 = arith.addf %38, %57 : vector<2x16x32xf32>
    %59 = vector.extract_strided_slice %19 {offsets = [0, 1, 0], sizes = [2, 1, 16], strides = [1, 1, 1]} : vector<2x8x16xf32> to vector<2x1x16xf32>
    %60 = vector.shape_cast %59 : vector<2x1x16xf32> to vector<2x16xf32>
    %61 = vector.shape_cast %60 : vector<2x16xf32> to vector<2x16x1xf32>
    %62 = vector.broadcast %61 : vector<2x16x1xf32> to vector<2x16x32xf32>
    %63 = arith.mulf %62, %58 : vector<2x16x32xf32>
    %cst_25 = arith.constant dense<0.000000e+00> : vector<2x32xf32>
    %64 = vector.multi_reduction <add>, %63, %cst_25 [1] : vector<2x16x32xf32> to vector<2x32xf32>
    %65 = vector.extract_strided_slice %37 {offsets = [0, 1, 0], sizes = [2, 1, 32], strides = [1, 1, 1]} : vector<2x8x32xf32> to vector<2x1x32xf32>
    %66 = vector.shape_cast %65 : vector<2x1x32xf32> to vector<2x32xf32>
    %67 = vector.shape_cast %66 : vector<2x32xf32> to vector<2x1x32xf32>
    %68 = vector.extract_strided_slice %30 {offsets = [0, 1, 0], sizes = [2, 1, 32], strides = [1, 1, 1]} : vector<2x8x32xf32> to vector<2x1x32xf32>
    %69 = vector.shape_cast %68 : vector<2x1x32xf32> to vector<2x32xf32>
    %70 = vector.shape_cast %69 : vector<2x32xf32> to vector<2x1x32xf32>
    %71 = vector.shape_cast %60 : vector<2x16xf32> to vector<2x16x1xf32>
    %72 = vector.broadcast %70 : vector<2x1x32xf32> to vector<2x16x32xf32>
    %73 = arith.mulf %72, %58 : vector<2x16x32xf32>
    %74 = vector.broadcast %67 : vector<2x1x32xf32> to vector<2x16x32xf32>
    %75 = arith.subf %74, %73 : vector<2x16x32xf32>
    %76 = vector.broadcast %71 : vector<2x16x1xf32> to vector<2x16x32xf32>
    %77 = arith.mulf %76, %75 : vector<2x16x32xf32>
    %78 = arith.addf %58, %77 : vector<2x16x32xf32>
    %79 = vector.extract_strided_slice %19 {offsets = [0, 2, 0], sizes = [2, 1, 16], strides = [1, 1, 1]} : vector<2x8x16xf32> to vector<2x1x16xf32>
    %80 = vector.shape_cast %79 : vector<2x1x16xf32> to vector<2x16xf32>
    %81 = vector.shape_cast %80 : vector<2x16xf32> to vector<2x16x1xf32>
    %82 = vector.broadcast %81 : vector<2x16x1xf32> to vector<2x16x32xf32>
    %83 = arith.mulf %82, %78 : vector<2x16x32xf32>
    %cst_26 = arith.constant dense<0.000000e+00> : vector<2x32xf32>
    %84 = vector.multi_reduction <add>, %83, %cst_26 [1] : vector<2x16x32xf32> to vector<2x32xf32>
    %85 = vector.extract_strided_slice %37 {offsets = [0, 2, 0], sizes = [2, 1, 32], strides = [1, 1, 1]} : vector<2x8x32xf32> to vector<2x1x32xf32>
    %86 = vector.shape_cast %85 : vector<2x1x32xf32> to vector<2x32xf32>
    %87 = vector.shape_cast %86 : vector<2x32xf32> to vector<2x1x32xf32>
    %88 = vector.extract_strided_slice %30 {offsets = [0, 2, 0], sizes = [2, 1, 32], strides = [1, 1, 1]} : vector<2x8x32xf32> to vector<2x1x32xf32>
    %89 = vector.shape_cast %88 : vector<2x1x32xf32> to vector<2x32xf32>
    %90 = vector.shape_cast %89 : vector<2x32xf32> to vector<2x1x32xf32>
    %91 = vector.shape_cast %80 : vector<2x16xf32> to vector<2x16x1xf32>
    %92 = vector.broadcast %90 : vector<2x1x32xf32> to vector<2x16x32xf32>
    %93 = arith.mulf %92, %78 : vector<2x16x32xf32>
    %94 = vector.broadcast %87 : vector<2x1x32xf32> to vector<2x16x32xf32>
    %95 = arith.subf %94, %93 : vector<2x16x32xf32>
    %96 = vector.broadcast %91 : vector<2x16x1xf32> to vector<2x16x32xf32>
    %97 = arith.mulf %96, %95 : vector<2x16x32xf32>
    %98 = arith.addf %78, %97 : vector<2x16x32xf32>
    %99 = vector.extract_strided_slice %19 {offsets = [0, 3, 0], sizes = [2, 1, 16], strides = [1, 1, 1]} : vector<2x8x16xf32> to vector<2x1x16xf32>
    %100 = vector.shape_cast %99 : vector<2x1x16xf32> to vector<2x16xf32>
    %101 = vector.shape_cast %100 : vector<2x16xf32> to vector<2x16x1xf32>
    %102 = vector.broadcast %101 : vector<2x16x1xf32> to vector<2x16x32xf32>
    %103 = arith.mulf %102, %98 : vector<2x16x32xf32>
    %cst_27 = arith.constant dense<0.000000e+00> : vector<2x32xf32>
    %104 = vector.multi_reduction <add>, %103, %cst_27 [1] : vector<2x16x32xf32> to vector<2x32xf32>
    %105 = vector.extract_strided_slice %37 {offsets = [0, 3, 0], sizes = [2, 1, 32], strides = [1, 1, 1]} : vector<2x8x32xf32> to vector<2x1x32xf32>
    %106 = vector.shape_cast %105 : vector<2x1x32xf32> to vector<2x32xf32>
    %107 = vector.shape_cast %106 : vector<2x32xf32> to vector<2x1x32xf32>
    %108 = vector.extract_strided_slice %30 {offsets = [0, 3, 0], sizes = [2, 1, 32], strides = [1, 1, 1]} : vector<2x8x32xf32> to vector<2x1x32xf32>
    %109 = vector.shape_cast %108 : vector<2x1x32xf32> to vector<2x32xf32>
    %110 = vector.shape_cast %109 : vector<2x32xf32> to vector<2x1x32xf32>
    %111 = vector.shape_cast %100 : vector<2x16xf32> to vector<2x16x1xf32>
    %112 = vector.broadcast %110 : vector<2x1x32xf32> to vector<2x16x32xf32>
    %113 = arith.mulf %112, %98 : vector<2x16x32xf32>
    %114 = vector.broadcast %107 : vector<2x1x32xf32> to vector<2x16x32xf32>
    %115 = arith.subf %114, %113 : vector<2x16x32xf32>
    %116 = vector.broadcast %111 : vector<2x16x1xf32> to vector<2x16x32xf32>
    %117 = arith.mulf %116, %115 : vector<2x16x32xf32>
    %118 = arith.addf %98, %117 : vector<2x16x32xf32>
    %119 = vector.extract_strided_slice %19 {offsets = [0, 4, 0], sizes = [2, 1, 16], strides = [1, 1, 1]} : vector<2x8x16xf32> to vector<2x1x16xf32>
    %120 = vector.shape_cast %119 : vector<2x1x16xf32> to vector<2x16xf32>
    %121 = vector.shape_cast %120 : vector<2x16xf32> to vector<2x16x1xf32>
    %122 = vector.broadcast %121 : vector<2x16x1xf32> to vector<2x16x32xf32>
    %123 = arith.mulf %122, %118 : vector<2x16x32xf32>
    %cst_28 = arith.constant dense<0.000000e+00> : vector<2x32xf32>
    %124 = vector.multi_reduction <add>, %123, %cst_28 [1] : vector<2x16x32xf32> to vector<2x32xf32>
    %125 = vector.extract_strided_slice %37 {offsets = [0, 4, 0], sizes = [2, 1, 32], strides = [1, 1, 1]} : vector<2x8x32xf32> to vector<2x1x32xf32>
    %126 = vector.shape_cast %125 : vector<2x1x32xf32> to vector<2x32xf32>
    %127 = vector.shape_cast %126 : vector<2x32xf32> to vector<2x1x32xf32>
    %128 = vector.extract_strided_slice %30 {offsets = [0, 4, 0], sizes = [2, 1, 32], strides = [1, 1, 1]} : vector<2x8x32xf32> to vector<2x1x32xf32>
    %129 = vector.shape_cast %128 : vector<2x1x32xf32> to vector<2x32xf32>
    %130 = vector.shape_cast %129 : vector<2x32xf32> to vector<2x1x32xf32>
    %131 = vector.shape_cast %120 : vector<2x16xf32> to vector<2x16x1xf32>
    %132 = vector.broadcast %130 : vector<2x1x32xf32> to vector<2x16x32xf32>
    %133 = arith.mulf %132, %118 : vector<2x16x32xf32>
    %134 = vector.broadcast %127 : vector<2x1x32xf32> to vector<2x16x32xf32>
    %135 = arith.subf %134, %133 : vector<2x16x32xf32>
    %136 = vector.broadcast %131 : vector<2x16x1xf32> to vector<2x16x32xf32>
    %137 = arith.mulf %136, %135 : vector<2x16x32xf32>
    %138 = arith.addf %118, %137 : vector<2x16x32xf32>
    %139 = vector.extract_strided_slice %19 {offsets = [0, 5, 0], sizes = [2, 1, 16], strides = [1, 1, 1]} : vector<2x8x16xf32> to vector<2x1x16xf32>
    %140 = vector.shape_cast %139 : vector<2x1x16xf32> to vector<2x16xf32>
    %141 = vector.shape_cast %140 : vector<2x16xf32> to vector<2x16x1xf32>
    %142 = vector.broadcast %141 : vector<2x16x1xf32> to vector<2x16x32xf32>
    %143 = arith.mulf %142, %138 : vector<2x16x32xf32>
    %cst_29 = arith.constant dense<0.000000e+00> : vector<2x32xf32>
    %144 = vector.multi_reduction <add>, %143, %cst_29 [1] : vector<2x16x32xf32> to vector<2x32xf32>
    %145 = vector.extract_strided_slice %37 {offsets = [0, 5, 0], sizes = [2, 1, 32], strides = [1, 1, 1]} : vector<2x8x32xf32> to vector<2x1x32xf32>
    %146 = vector.shape_cast %145 : vector<2x1x32xf32> to vector<2x32xf32>
    %147 = vector.shape_cast %146 : vector<2x32xf32> to vector<2x1x32xf32>
    %148 = vector.extract_strided_slice %30 {offsets = [0, 5, 0], sizes = [2, 1, 32], strides = [1, 1, 1]} : vector<2x8x32xf32> to vector<2x1x32xf32>
    %149 = vector.shape_cast %148 : vector<2x1x32xf32> to vector<2x32xf32>
    %150 = vector.shape_cast %149 : vector<2x32xf32> to vector<2x1x32xf32>
    %151 = vector.shape_cast %140 : vector<2x16xf32> to vector<2x16x1xf32>
    %152 = vector.broadcast %150 : vector<2x1x32xf32> to vector<2x16x32xf32>
    %153 = arith.mulf %152, %138 : vector<2x16x32xf32>
    %154 = vector.broadcast %147 : vector<2x1x32xf32> to vector<2x16x32xf32>
    %155 = arith.subf %154, %153 : vector<2x16x32xf32>
    %156 = vector.broadcast %151 : vector<2x16x1xf32> to vector<2x16x32xf32>
    %157 = arith.mulf %156, %155 : vector<2x16x32xf32>
    %158 = arith.addf %138, %157 : vector<2x16x32xf32>
    %159 = vector.extract_strided_slice %19 {offsets = [0, 6, 0], sizes = [2, 1, 16], strides = [1, 1, 1]} : vector<2x8x16xf32> to vector<2x1x16xf32>
    %160 = vector.shape_cast %159 : vector<2x1x16xf32> to vector<2x16xf32>
    %161 = vector.shape_cast %160 : vector<2x16xf32> to vector<2x16x1xf32>
    %162 = vector.broadcast %161 : vector<2x16x1xf32> to vector<2x16x32xf32>
    %163 = arith.mulf %162, %158 : vector<2x16x32xf32>
    %cst_30 = arith.constant dense<0.000000e+00> : vector<2x32xf32>
    %164 = vector.multi_reduction <add>, %163, %cst_30 [1] : vector<2x16x32xf32> to vector<2x32xf32>
    %165 = vector.extract_strided_slice %37 {offsets = [0, 6, 0], sizes = [2, 1, 32], strides = [1, 1, 1]} : vector<2x8x32xf32> to vector<2x1x32xf32>
    %166 = vector.shape_cast %165 : vector<2x1x32xf32> to vector<2x32xf32>
    %167 = vector.shape_cast %166 : vector<2x32xf32> to vector<2x1x32xf32>
    %168 = vector.extract_strided_slice %30 {offsets = [0, 6, 0], sizes = [2, 1, 32], strides = [1, 1, 1]} : vector<2x8x32xf32> to vector<2x1x32xf32>
    %169 = vector.shape_cast %168 : vector<2x1x32xf32> to vector<2x32xf32>
    %170 = vector.shape_cast %169 : vector<2x32xf32> to vector<2x1x32xf32>
    %171 = vector.shape_cast %160 : vector<2x16xf32> to vector<2x16x1xf32>
    %172 = vector.broadcast %170 : vector<2x1x32xf32> to vector<2x16x32xf32>
    %173 = arith.mulf %172, %158 : vector<2x16x32xf32>
    %174 = vector.broadcast %167 : vector<2x1x32xf32> to vector<2x16x32xf32>
    %175 = arith.subf %174, %173 : vector<2x16x32xf32>
    %176 = vector.broadcast %171 : vector<2x16x1xf32> to vector<2x16x32xf32>
    %177 = arith.mulf %176, %175 : vector<2x16x32xf32>
    %178 = arith.addf %158, %177 : vector<2x16x32xf32>
    %179 = vector.extract_strided_slice %19 {offsets = [0, 7, 0], sizes = [2, 1, 16], strides = [1, 1, 1]} : vector<2x8x16xf32> to vector<2x1x16xf32>
    %180 = vector.shape_cast %179 : vector<2x1x16xf32> to vector<2x16xf32>
    %181 = vector.shape_cast %180 : vector<2x16xf32> to vector<2x16x1xf32>
    %182 = vector.broadcast %181 : vector<2x16x1xf32> to vector<2x16x32xf32>
    %183 = arith.mulf %182, %178 : vector<2x16x32xf32>
    %cst_31 = arith.constant dense<0.000000e+00> : vector<2x32xf32>
    %184 = vector.multi_reduction <add>, %183, %cst_31 [1] : vector<2x16x32xf32> to vector<2x32xf32>
    %185 = vector.extract_strided_slice %37 {offsets = [0, 7, 0], sizes = [2, 1, 32], strides = [1, 1, 1]} : vector<2x8x32xf32> to vector<2x1x32xf32>
    %186 = vector.shape_cast %185 : vector<2x1x32xf32> to vector<2x32xf32>
    %187 = vector.shape_cast %186 : vector<2x32xf32> to vector<2x1x32xf32>
    %188 = vector.extract_strided_slice %30 {offsets = [0, 7, 0], sizes = [2, 1, 32], strides = [1, 1, 1]} : vector<2x8x32xf32> to vector<2x1x32xf32>
    %189 = vector.shape_cast %188 : vector<2x1x32xf32> to vector<2x32xf32>
    %190 = vector.shape_cast %189 : vector<2x32xf32> to vector<2x1x32xf32>
    %191 = vector.shape_cast %180 : vector<2x16xf32> to vector<2x16x1xf32>
    %192 = vector.broadcast %190 : vector<2x1x32xf32> to vector<2x16x32xf32>
    %193 = arith.mulf %192, %178 : vector<2x16x32xf32>
    %194 = vector.broadcast %187 : vector<2x1x32xf32> to vector<2x16x32xf32>
    %195 = arith.subf %194, %193 : vector<2x16x32xf32>
    %196 = vector.broadcast %191 : vector<2x16x1xf32> to vector<2x16x32xf32>
    %197 = arith.mulf %196, %195 : vector<2x16x32xf32>
    %198 = arith.addf %178, %197 : vector<2x16x32xf32>
    %c0_32 = arith.constant 0 : index
    %c0_33 = arith.constant 0 : index
    %c0_34 = arith.constant 0 : index
    %199 = vector.load %arg11[%c0_32, %c0_33, %c0_34] : memref<2x16x32xf32, #tpu.memory_space<vmem>>, vector<2x16x32xf32>
    tpu.vector_store %arg11[%c0_32, %c0_33, %c0_34], %198 {strides = array<i32>} : memref<2x16x32xf32, #tpu.memory_space<vmem>>, vector<2x16x32xf32>,
    %200 = tpu.concatenate %44, %64, %84, %104, %124, %144, %164, %184 in 1 : vector<2x32xf32>, vector<2x32xf32>, vector<2x32xf32>, vector<2x32xf32>, vector<2x32xf32>, vector<2x32xf32>, vector<2x32xf32>, vector<2x32xf32> -> vector<2x256xf32>
    %c0_35 = arith.constant 0 : index
    %c0_36 = arith.constant 0 : index
    %201 = vector.load %arg10[%c0_35, %c0_36] : memref<2x256xf32, #tpu.memory_space<vmem>>, vector<2x256xf32>
    tpu.vector_store %arg10[%c0_35, %c0_36], %200 {strides = array<i32>} : memref<2x256xf32, #tpu.memory_space<vmem>>, vector<2x256xf32>,
    return
  }
  func.func @transform_0(%arg0: i32, %arg1: i32) -> (i32, i32, i32) {
    %c0_i32 = arith.constant 0 : i32
    %c0_i32_0 = arith.constant 0 : i32
    return %arg0, %arg1, %c0_i32 : i32, i32, i32
  }
  func.func @transform_1(%arg0: i32, %arg1: i32) -> (i32, i32, i32) {
    %c0_i32 = arith.constant 0 : i32
    %c0_i32_0 = arith.constant 0 : i32
    return %arg0, %arg1, %c0_i32 : i32, i32, i32
  }
  func.func @transform_2(%arg0: i32, %arg1: i32) -> (i32, i32) {
    %c0_i32 = arith.constant 0 : i32
    %c0_i32_0 = arith.constant 0 : i32
    %c0_i32_1 = arith.constant 0 : i32
    return %c0_i32, %c0_i32_0 : i32, i32
  }
  func.func @transform_3(%arg0: i32, %arg1: i32) -> (i32, i32) {
    %c0_i32 = arith.constant 0 : i32
    %c0_i32_0 = arith.constant 0 : i32
    %c0_i32_1 = arith.constant 0 : i32
    return %c0_i32, %c0_i32_0 : i32, i32
  }
  func.func @transform_4(%arg0: i32, %arg1: i32) -> (i32, i32) {
    %c0_i32 = arith.constant 0 : i32
    %c0_i32_0 = arith.constant 0 : i32
    %c0_i32_1 = arith.constant 0 : i32
    return %c0_i32, %c0_i32_0 : i32, i32
  }
  func.func @transform_5(%arg0: i32, %arg1: i32) -> (i32, i32) {
    %c0_i32 = arith.constant 0 : i32
    %c0_i32_0 = arith.constant 0 : i32
    %c0_i32_1 = arith.constant 0 : i32
    return %c0_i32, %c0_i32_0 : i32, i32
  }
  func.func @transform_6(%arg0: i32, %arg1: i32) -> (i32, i32) {
    %c0_i32 = arith.constant 0 : i32
    %c0_i32_0 = arith.constant 0 : i32
    %c0_i32_1 = arith.constant 0 : i32
    return %c0_i32, %c0_i32_0 : i32, i32
  }
  func.func @transform_7(%arg0: i32, %arg1: i32) -> (i32, i32) {
    %c0_i32 = arith.constant 0 : i32
    %c0_i32_0 = arith.constant 0 : i32
    %c0_i32_1 = arith.constant 0 : i32
    return %c0_i32, %c0_i32_0 : i32, i32
  }
  func.func @transform_8(%arg0: i32, %arg1: i32) -> (i32, i32) {
    %c0_i32 = arith.constant 0 : i32
    return %arg0, %arg1 : i32, i32
  }
}

</mosaic_0001>

<bundles_post_ra>
// kernel: tpu_custom_call.1
= control target key start
LH: loop header
LB: loop body
LE: loop exit
PB: predicated region body
PF: predicated region fallthrough
CT: control target
= control target key end

     0   :  { %13 = vsyncpa [#allocation4], 0  ;;  %s1804_s0 = inlined_call_operand.hbm [shape: f32[2,8,32], index: 0, kind: input, shape index: {}]   ;;  %s1805_s1 = inlined_call_operand.hbm [shape: f32[2,8,32], index: 1, kind: input, shape index: {}]   ;;  %s1806_s2 = inlined_call_operand.vmem [shape: f32[32,16], index: 2, kind: input, shape index: {}]   ;;  %s1807_s3 = inlined_call_operand.hbm [shape: f32[16,32], index: 3, kind: input, shape index: {}]   ;;  %s1808_s4 = inlined_call_operand.vmem [shape: f32[32,32], index: 4, kind: input, shape index: {}]   ;;  %s1809_s5 = inlined_call_operand.vmem [shape: f32[1,32], index: 5, kind: input, shape index: {}]   ;;  %s1810_s6 = inlined_call_operand.vmem [shape: f32[32,32], index: 6, kind: input, shape index: {}]   ;;  %s1811_s7 = inlined_call_operand.vmem [shape: f32[1,32], index: 7, kind: input, shape index: {}]   ;;  %s1812_s8 = inlined_call_operand.hbm [shape: f32[2,256], index: 8, kind: output, shape index: {}]  }
   0x1   :  { %14 = vsyncpa [#allocation7], 0 }
   0x2   :  { %15 = vsyncpa [#allocation5], 0  ;;  %s1293_s27 = smov [#allocation6]   ;;  %s1294_s29 = smov [#allocation3]  }
   0x3   :  { %s33_s28 = sshll.u32 %s1293_s27, 4  ;;  %s21_s30 = sshll.u32 %s1294_s29, 4  ;;  %s34_s28 = int_to_ptr.vmem [resolvable:$true] %s33_s28  ;;  %s1347_s30 = int_to_ptr.vmem [resolvable:$true] %s21_s30 }
   0x4   :  { %s1199_s11 = scalar_lea.hbm %s1805_s1, 256 }
   0x5   :  { %p1200_p0 = scmp.ne.s32.totalorder %s1805_s1, %s1199_s11  ;;  %p1203_p1 = scmp.lt.u32.totalorder %s1199_s11, %s1805_s1 }
   0x7   :  { %p1205_p2 = pnand %p1203_p1, %p1200_p0 }
   0x9   :  { %1208 = shalt.err (!%p1205_p2)
}
   0xa   :  { %s1209_s16 = scalar_lea.vmem %s34_s28, 256  ;;  %p1214_p4 = scmp.lt.s32.totalorder %s34_s28, %s34_s28 }
   0xb   :  { %p1210_p3 = scmp.ne.s32.totalorder %s34_s28, %s1209_s16  ;;  %p1215_p5 = scmp.lt.s32.totalorder %s1209_s16, %s1209_s16 }
   0xd   :  { %p1216_p6 = por %p1215_p5, %p1214_p4 }
   0xf   :  { %p1217_p7 = pnand %p1216_p6, %p1210_p3 }
  0x11   :  { %1220 = shalt.err (!%p1217_p7)
}
  0x12   :  { %s1295_s17 = smov 128   ;;  %s1296_s18 = smov 8  }
  0x13   :  { %39 = dma.hbm_to_vmem [thread:$0]  %s1805_s1, 256, %s34_s28, [#allocation7], %s1295_s17, %s1295_s17, %s1296_s18  }
  0x14   :  { %s1221_s23 = scalar_lea.hbm %s1804_s0, 256 }
  0x15   :  { %p1222_p8 = scmp.ne.s32.totalorder %s1804_s0, %s1221_s23  ;;  %p1225_p9 = scmp.lt.u32.totalorder %s1221_s23, %s1804_s0 }
  0x17   :  { %p1227_p10 = pnand %p1225_p9, %p1222_p8 }
  0x19   :  { %1230 = shalt.err (!%p1227_p10)
}
  0x1a   :  { %s1231_s29 = scalar_lea.vmem %s1347_s30, 256  ;;  %p1236_p12 = scmp.lt.s32.totalorder %s1347_s30, %s1347_s30 }
  0x1b   :  { %p1232_p11 = scmp.ne.s32.totalorder %s1347_s30, %s1231_s29  ;;  %p1237_p13 = scmp.lt.s32.totalorder %s1231_s29, %s1231_s29 }
  0x1d   :  { %p1238_p0 = por %p1237_p13, %p1236_p12 }
  0x1f   :  { %p1239_p1 = pnand %p1238_p0, %p1232_p11 }
  0x21   :  { %1242 = shalt.err (!%p1239_p1)
}
  0x22   :  { %27 = dma.hbm_to_vmem [thread:$0]  %s1804_s0, 256, %s1347_s30, [#allocation4], %s1295_s17, %s1295_s17, %s1296_s18  }
  0x23   :  { %s1297_s9 = smov [#allocation8]   ;;  %s1243_s13 = scalar_lea.hbm %s1807_s3, 256 }
  0x24   :  { %s47_s10 = sshll.u32 %s1297_s9, 4  ;;  %p1244_p2 = scmp.ne.s32.totalorder %s1807_s3, %s1243_s13  ;;  %s48_s10 = int_to_ptr.vmem [resolvable:$true] %s47_s10 }
  0x25   :  { %p1247_p3 = scmp.lt.u32.totalorder %s1243_s13, %s1807_s3 }
  0x27   :  { %p1249_p4 = pnand %p1247_p3, %p1244_p2 }
  0x29   :  { %1252 = shalt.err (!%p1249_p4)
}
  0x2a   :  { %s1253_s20 = scalar_lea.vmem %s48_s10, 256  ;;  %p1258_p6 = scmp.lt.s32.totalorder %s48_s10, %s48_s10 }
  0x2b   :  { %p1254_p5 = scmp.ne.s32.totalorder %s48_s10, %s1253_s20  ;;  %p1259_p7 = scmp.lt.s32.totalorder %s1253_s20, %s1253_s20 }
  0x2d   :  { %p1260_p8 = por %p1259_p7, %p1258_p6 }
  0x2f   :  { %p1261_p9 = pnand %p1260_p8, %p1254_p5 }
  0x31   :  { %1264 = shalt.err (!%p1261_p9)
}
  0x32   :  { %53 = dma.hbm_to_vmem [thread:$0]  %s1807_s3, 256, %s48_s10, [#allocation7], %s1295_s17, %s1295_s17, %s1296_s18  }
  0x33   :  { %1287 = dma.done.wait [#allocation4], 256  }
  0x34   :  { %1288 = vsyncadd [#allocation4], 4294967040 }
  0x35   :  { %1289 = dma.done.wait [#allocation7], 512  }
  0x36   :  { %1290 = vsyncadd [#allocation7], 4294966784  ;;  %vm77_vm0 = vcmask 261120   ;;  %v86_v0 = vld [vmem:[%s1806_s2] sm:$0xff]  ;;  %v87_v1 = vld [vmem:[%s1806_s2 + $0x8] sm:$0xff]  ;;  %vm172_vm1 = vcmask 130048   ;;  %v391_v52 = vlaneseq }
  0x37   :  { %v88_v2 = vld [vmem:[%s1806_s2 + $0x10] sm:$0xff]  ;;  %v1146_v3 = vpack.c.bf16 %v87_v1, %v86_v0  ;;  %v89_v4 = vld [vmem:[%s1806_s2 + $0x18] sm:$0xff]  ;;  %v82_v5 = vld [vmem:[#allocation3] sm:$0xff]  ;;  %vm1005_vm2 = vcmask 1041409   ;;  %s1300_s21 = smov 96   ;;  %vm1049_vm3 = vcmask 523264  }
  0x38   :  { %v1150_v6 = vpack.c.bf16 %v89_v4, %v88_v2  ;;  %1121 = vmatprep.mubr.msk.f32.mxu0 %vm77_vm0, %v82_v5  ;;  %v83_v7 = vld [vmem:[#allocation3 + $0x8] sm:$0xff]  ;;  %v195_v12 = vld [vmem:[%s1808_s4] sm:$0xff]  ;;  %v197_v14 = vld [vmem:[%s1808_s4 + $0x10] sm:$0xff]  ;;  %v1457_v54 = vshrl.u32 %v391_v52, 7  ;;  %vm1051_vm4 = vcmask 785408   ;;  %s1301_s22 = smov [#allocation9]  }
  0x39   :  { %1147 = vmatprep.subr.bf16.mxu0 %v1146_v3  ;;  %v196_v13 = vld [vmem:[%s1808_s4 + $0x8] sm:$0xff]  ;;  %v198_v16 = vld [vmem:[%s1808_s4 + $0x18] sm:$0xff]  ;;  %v84_v17 = vld [vmem:[#allocation6] sm:$0xff]  ;;  %s1074_s23 = sshll.u32 %s1301_s22, 4  ;;  %s1075_s23 = int_to_ptr.vmem [resolvable:$true] %s1074_s23 }
  0x3a   :  { %1149 = vmatpush3.bf16.msra.mxu0 %v1146_v3  ;;  %v1154_v15 = vpack.c.bf16 %v196_v13, %v195_v12  ;;  %v1158_v18 = vpack.c.bf16 %v198_v16, %v197_v14  ;;  %1132 = vmatprep.mubr.msk.f32.mxu1 %vm77_vm0, %v84_v17  ;;  %v299_v19 = vld [vmem:[%s1810_s6] sm:$0xff]  ;;  %v300_v20 = vld [vmem:[%s1810_s6 + $0x8] sm:$0xff]  ;;  %v301_v21 = vld [vmem:[%s1810_s6 + $0x10] sm:$0xff]  ;;  %v393_v58 = vsub.s32 0, %v1457_v54  ;;  %v469_v0 = vsub.s32 1, %v1457_v54  ;;  %s1265_s24 = scalar_lea.vmem %s1075_s23, 64  ;;  %p1270_p11 = scmp.lt.s32.totalorder %s1075_s23, %s1075_s23 }
  0x3b   :  { %1151 = vmatprep.subr.bf16.mxu0 %v1150_v6  ;;  %v1162_v22 = vpack.c.bf16 %v300_v20, %v299_v19  ;;  %v302_v23 = vld [vmem:[%s1810_s6 + $0x18] sm:$0xff]  ;;  %v1086_v40 = vld [vmem:[%s1809_s5] ss:$0 sm:$0xff]  ;;  %v76_v56 = vld [vmem:[#allocation8 + $0x8] sm:$0xff]  ;;  %v545_v14 = vsub.s32 2, %v1457_v54  ;;  %s1298_s5 = smov 32   ;;  %p1266_p10 = scmp.ne.s32.totalorder %s1075_s23, %s1265_s24 }
  0x3c   :  { %1155 = vmatprep.subr.bf16.mxu1 %v1154_v15  ;;  %v1166_v24 = vpack.c.bf16 %v302_v23, %v301_v21  ;;  %v85_v25 = vld [vmem:[#allocation6 + $0x8] sm:$0xff]  ;;  %v1091_v46 = vld [vmem:[%s1811_s7] ss:$0 sm:$0xff]  ;;  %81 = vst.msk [vmem:[#allocation2 + $0x18] sm:$0xff] %vm77_vm0, %v76_v56  ;;  %79 = vst.msk [vmem:[#allocation2 + $0x8] sm:$0xff] %vm77_vm0, %v76_v56  ;;  %v621_v21 = vsub.s32 3, %v1457_v54  ;;  %p1271_p12 = scmp.lt.s32.totalorder %s1265_s24, %s1265_s24 }
  0x3d   :  { %1157 = vmatpush3.bf16.msra.mxu1 %v1154_v15  ;;  %v75_v53 = vld [vmem:[#allocation8] sm:$0xff]  ;;  %s1299_s7 = smov 64  }
  0x3e   :  { %1153 = vmatpush3.bf16.msra.mxu0 %v1150_v6  ;;  %1159 = vmatprep.subr.bf16.mxu1 %v1158_v18  ;;  %80 = vst.msk [vmem:[#allocation2 + $0x10] sm:$0xff] %vm77_vm0, %v75_v53  ;;  %78 = vst.msk [vmem:[#allocation2] sm:$0xff] %vm77_vm0, %v75_v53  ;;  %v925_v53 = vsub.s32 7, %v1457_v54  ;;  %p1272_p13 = por %p1271_p12, %p1270_p11 }
  0x3f   :  { %1163 = vmatprep.subr.bf16.mxu0 %v1162_v22 }
  0x40   :  { %p1273_p0 = pnand %p1272_p13, %p1266_p10 }
  0x41   :  { %1122 = vmatmul.mubr.msk.f32.vlgmr.msra.gmra.mrb[0].mxu0 %vm77_vm0, %v83_v7  ;;  %1161 = vmatpush3.bf16.msra.mxu1 %v1158_v18 }
  0x42   :  { %1143 = vmatprep.mubr.msk.f32.mxu0 %vm77_vm0, %v84_v17  ;;  %1165 = vmatpush3.bf16.msra.mxu0 %v1162_v22 }
  0x43   :  { %1167 = vmatprep.subr.bf16.mxu0 %v1166_v24  ;;  %v1515_v19 = vld [vmem:[#allocation2 + $0x8] sm:$0xff] }
  0x44   :  { %1133 = vmatmul.mubr.msk.f32.vlgmr.msra.gmra.mrb[0].mxu1 %vm77_vm0, %v85_v25 }
  0x45   :  { %v1471_v62 = vld [vmem:[#allocation2 + $0x10] sm:$0xff]  ;;  %v1488_v7 = vld [vmem:[#allocation2] sm:$0xff] }
  0x46   :  { %1169 = vmatpush3.bf16.msra.mxu0 %v1166_v24 }
  0x49   :  { %1144 = vmatmul.mubr.msk.f32.vlgmr.msra.gmra.mrb[2].mxu0 %vm77_vm0, %v85_v25 }
 0x114   :  { %v1123_v8 = vpop.f32.mrb[0].mxu0 }
 0x115   :  { %v163_v9 = vpop.f32.mrb[1].mxu0  ;;  %v176_v11 = vsel %vm172_vm1, %v1123_v8, -inf }
 0x116   :  { %v173_v10 = vsel %vm172_vm1, %v163_v9, -inf }
 0x117   :  { %174 = vmax.xlane.f32.xlu0 %v173_v10  ;;  %v1134_v36 = vpop.f32.mrb[0].mxu1 }
 0x118   :  { %v278_v37 = vpop.f32.mrb[1].mxu1  ;;  %v284_v41 = vadd.f32 %v1134_v36, %v1086_v40 }
 0x119   :  { %v279_v43 = vadd.f32 %v1086_v40, %v278_v37 }
 0x11a   :  { %v1090_v42 = vmul.f32 -1.442695, %v284_v41 }
 0x11b   :  { %177 = vmax.xlane.f32.xlu0 %v176_v11  ;;  %v1089_v44 = vmul.f32 -1.442695, %v279_v43 }
 0x11c   :  { %v1145_v38 = vpop.f32.mrb[2].mxu0 }
 0x11d   :  { %v376_v39 = vpop.f32.mrb[3].mxu0  ;;  %v382_v49 = vadd.f32 %v1145_v38, %v1091_v46 }
 0x11e   :  { %v377_v51 = vadd.f32 %v1091_v46, %v376_v39  ;;  %v849_v46 = vsub.s32 6, %v1457_v54 }
 0x1a4   :  { %v175_v26 = vpop.xlane.xlu0 %174 }
 0x1a5   :  { %v179_v27 = vsub.f32 %v163_v9, %v175_v26 }
 0x1a7   :  { %v181_v28 = vmul.f32 1.442695, %v179_v27 }
 0x1a8   :  { %v178_v29 = vpop.xlane.xlu0 %177 }
 0x1a9   :  { %1179 = vpow2.f32 %v181_v28  ;;  %v180_v30 = vsub.f32 %v1123_v8, %v178_v29  ;;  %v1490_v8 = vld [vmem:[#allocation2 + $0x18] sm:$0xff] }
 0x1ab   :  { %v183_v31 = vmul.f32 1.442695, %v180_v30 }
 0x1ad   :  { %1181 = vpow2.f32 %v183_v31  ;;  %v697_v31 = vsub.s32 4, %v1457_v54 }
 0x1ae   :  { %1183 = vpow2.f32 %v1090_v42 }
 0x1af   :  { %1185 = vpow2.f32 %v1089_v44 }
 0x1b3   :  { %v1443_v32 = vpop.eup %1179 }
 0x1b4   :  { %v185_v33 = vsel %vm172_vm1, %v1443_v32, 0.0 }
 0x1b5   :  { %186 = vadd.xlane.f32.xlu1 %v185_v33  ;;  %v773_v33 = vsub.s32 5, %v1457_v54 }
 0x1b7   :  { %v1447_v34 = vpop.eup %1181 }
 0x1b8   :  { %v188_v35 = vsel %vm172_vm1, %v1447_v34, 0.0  ;;  %v1184_v45 = vpop.eup %1183 }
 0x1b9   :  { %189 = vadd.xlane.f32.xlu1 %v188_v35  ;;  %v294_v47 = vadd.f32 1.0, %v1184_v45  ;;  %v1186_v48 = vpop.eup %1185 }
 0x1ba   :  { %v293_v50 = vadd.f32 1.0, %v1186_v48 }
 0x1bb   :  { %1187 = vrcp.f32 %v294_v47 }
 0x1bc   :  { %1189 = vtanh.f32 %v382_v49 }
 0x1bd   :  { %1191 = vrcp.f32 %v293_v50 }
 0x1be   :  { %1193 = vtanh.f32 %v377_v51 }
 0x1c5   :  { %v1461_v55 = vpop.eup %1187 }
 0x1c6   :  { %v1466_v59 = vpop.eup %1189  ;;  %v442_v60 = vrot.slane %v1461_v55, %v393_v58  ;;  %v1483_v4 = vrot.slane %v1461_v55, %v469_v0  ;;  %v1510_v16 = vrot.slane %v1461_v55, %v545_v14  ;;  %v1531_v26 = vrot.slane %v1461_v55, %v621_v21 }
 0x1c7   :  { %v1469_v61 = vpop.eup %1191  ;;  %v1475_v1 = vrot.slane %v1466_v59, %v393_v58  ;;  %v1507_v15 = vrot.slane %v1466_v59, %v469_v0  ;;  %v1522_v23 = vrot.slane %v1466_v59, %v545_v14  ;;  %v1546_v35 = vrot.slane %v1466_v59, %v621_v21 }
 0x1c8   :  { %v1478_v2 = vmul.f32 %v442_v60, %v1471_v62  ;;  %v1480_v3 = vpop.eup %1193  ;;  %v438_v6 = vrot.slane %v1469_v61, %v393_v58  ;;  %v1499_v11 = vmul.f32 %v442_v60, %v1490_v8  ;;  %v1513_v17 = vrot.slane %v1469_v61, %v469_v0 }
 0x1c9   :  { %v1493_v9 = vrot.slane %v1480_v3, %v393_v58  ;;  %v1525_v24 = vrot.slane %v1480_v3, %v469_v0  ;;  %v1534_v27 = vrot.slane %v1469_v61, %v545_v14  ;;  %v1549_v36 = vrot.slane %v1480_v3, %v545_v14 }
 0x1ca   :  { %v457_v5 = vsub.f32 %v1475_v1, %v1478_v2  ;;  %v1496_v10 = vmul.f32 %v438_v6, %v1488_v7  ;;  %v458_v13 = vsub.f32 %v1475_v1, %v1499_v11  ;;  %v1528_v25 = vmul.f32 %v438_v6, %v1515_v19 }
 0x1cb   :  { %v1555_v37 = vrot.slane %v1469_v61, %v621_v21  ;;  %v1558_v38 = vrot.slane %v1461_v55, %v773_v33  ;;  %v1561_v39 = vrot.slane %v1469_v61, %v697_v31  ;;  %v1565_v41 = vrot.slane %v1466_v59, %v697_v31 }
 0x1cc   :  { %v455_v12 = vsub.f32 %v1493_v9, %v1496_v10  ;;  %v1568_v42 = vrot.slane %v1480_v3, %v621_v21  ;;  %v1571_v43 = vrot.slane %v1466_v59, %v773_v33  ;;  %v1574_v44 = vrot.slane %v1480_v3, %v697_v31 }
 0x1cd   :  { %v1580_v48 = vrot.slane %v1461_v55, %v849_v46  ;;  %v1583_v49 = vrot.slane %v1469_v61, %v773_v33  ;;  %v1586_v50 = vrot.slane %v1466_v59, %v849_v46  ;;  %v1589_v51 = vrot.slane %v1480_v3, %v773_v33 }
 0x1ce   :  { %v1594_v56 = vrot.slane %v1469_v61, %v849_v46  ;;  %v1610_v54 = vrot.slane %v1466_v59, %v925_v53 }
 0x242   :  { %v187_v57 = vpop.xlane.xlu1 %186 }
 0x243   :  { %1195 = vrcp.f32 %v187_v57  ;;  %v1597_v57 = vrot.slane %v1469_v61, %v925_v53 }
 0x246   :  { %v190_v63 = vpop.xlane.xlu1 %189 }
 0x247   :  { %1197 = vrcp.f32 %v190_v63  ;;  %v1604_v63 = vrot.slane %v1480_v3, %v849_v46 }
 0x24d   :  { %v1196_v18 = vpop.eup %1195 }
 0x24e   :  { %v1537_v28 = vmul.f32 %v1196_v18, %v1443_v32  ;;  %v1552_v32 = vrot.slane %v1461_v55, %v697_v31 }
 0x250   :  { %v394_v40 = vrot.slane %v1537_v28, %v393_v58  ;;  %v470_v47 = vrot.slane %v1537_v28, %v469_v0  ;;  %v546_v60 = vrot.slane %v1537_v28, %v545_v14  ;;  %v850_v18 = vrot.slane %v1537_v28, %v849_v46 }
 0x251   :  { %v1198_v20 = vpop.eup %1197 }
 0x252   :  { %v1519_v22 = vmul.f32 %v1198_v20, %v1447_v34  ;;  %v456_v34 = vsub.f32 %v1493_v9, %v1528_v25  ;;  %v926_v20 = vrot.slane %v1537_v28, %v925_v53 }
 0x254   :  { %v481_v29 = vrot.slane %v1519_v22, %v469_v0  ;;  %v405_v30 = vrot.slane %v1519_v22, %v393_v58  ;;  %v557_v45 = vrot.slane %v1519_v22, %v545_v14  ;;  %v633_v52 = vrot.slane %v1519_v22, %v621_v21 }
 0x255   :  { %v1600_v58 = vrot.slane %v1461_v55, %v925_v53  ;;  %v1607_v0 = vrot.slane %v1480_v3, %v925_v53  ;;  %v709_v6 = vrot.slane %v1519_v22, %v697_v31  ;;  %v622_v55 = vrot.slane %v1537_v28, %v621_v21 }
 0x256   :  { %483 = vbcast.lane.b32.xlu0 %v481_v29, 256  ;;  %407 = vbcast.lane.b32.xlu1 %v405_v30, 256  ;;  %v785_v61 = vrot.slane %v1519_v22, %v773_v33  ;;  %v698_v3 = vrot.slane %v1537_v28, %v697_v31  ;;  %v861_v59 = vrot.slane %v1519_v22, %v849_v46 }
 0x257   :  { %v774_v14 = vrot.slane %v1537_v28, %v773_v33  ;;  %v937_v21 = vrot.slane %v1519_v22, %v925_v53 }
 0x25a   :  { %396 = vbcast.lane.b32.xlu0 %v394_v40, 256  ;;  %411 = vbcast.lane.b32.xlu1 %v405_v30, 264 }
 0x25e   :  { %559 = vbcast.lane.b32.xlu0 %v557_v45, 256  ;;  %487 = vbcast.lane.b32.xlu1 %v481_v29, 264 }
 0x262   :  { %472 = vbcast.lane.b32.xlu0 %v470_v47, 256  ;;  %400 = vbcast.lane.b32.xlu1 %v394_v40, 264 }
 0x266   :  { %635 = vbcast.lane.b32.xlu0 %v633_v52, 256  ;;  %563 = vbcast.lane.b32.xlu1 %v557_v45, 264 }
 0x26a   :  { %548 = vbcast.lane.b32.xlu0 %v546_v60, 256  ;;  %476 = vbcast.lane.b32.xlu1 %v470_v47, 264 }
 0x26e   :  { %711 = vbcast.lane.b32.xlu0 %v709_v6, 256  ;;  %639 = vbcast.lane.b32.xlu1 %v633_v52, 264 }
 0x272   :  { %624 = vbcast.lane.b32.xlu0 %v622_v55, 256  ;;  %552 = vbcast.lane.b32.xlu1 %v546_v60, 264 }
 0x276   :  { %787 = vbcast.lane.b32.xlu0 %v785_v61, 256  ;;  %715 = vbcast.lane.b32.xlu1 %v709_v6, 264 }
 0x27a   :  { %700 = vbcast.lane.b32.xlu0 %v698_v3, 256  ;;  %628 = vbcast.lane.b32.xlu1 %v622_v55, 264 }
 0x27e   :  { %863 = vbcast.lane.b32.xlu0 %v861_v59, 256  ;;  %791 = vbcast.lane.b32.xlu1 %v785_v61, 264 }
 0x282   :  { %776 = vbcast.lane.b32.xlu0 %v774_v14, 256  ;;  %704 = vbcast.lane.b32.xlu1 %v698_v3, 264 }
 0x286   :  { %852 = vbcast.lane.b32.xlu0 %v850_v18, 256  ;;  %867 = vbcast.lane.b32.xlu1 %v861_v59, 264 }
 0x28a   :  { %928 = vbcast.lane.b32.xlu0 %v926_v20, 256  ;;  %780 = vbcast.lane.b32.xlu1 %v774_v14, 264 }
 0x28e   :  { %939 = vbcast.lane.b32.xlu0 %v937_v21, 256  ;;  %856 = vbcast.lane.b32.xlu1 %v850_v18, 264 }
 0x292   :  { %932 = vbcast.lane.b32.xlu1 %v926_v20, 264 }
 0x296   :  { %943 = vbcast.lane.b32.xlu1 %v937_v21, 264 }
 0x2c8   :  { %v484_v29 = vpop.permute.xlu0 %483  ;;  %v408_v30 = vpop.permute.xlu1 %407 }
 0x2c9   :  { %v461_v31 = vmul.f32 %v457_v5, %v408_v30  ;;  %v415_v33 = vmul.f32 %v408_v30, %v1471_v62 }
 0x2cb   :  { %v465_v40 = vadd.f32 %v461_v31, %v1471_v62  ;;  %v426_v2 = vsel %vm77_vm0, %v415_v33, 0.0 }
 0x2cc   :  { %v397_v45 = vpop.permute.xlu0 %396  ;;  %v412_v28 = vpop.permute.xlu1 %411 }
 0x2cd   :  { %v521_v46 = vmul.f32 %v1483_v4, %v465_v40  ;;  %v459_v22 = vmul.f32 %v455_v12, %v397_v45  ;;  %v416_v47 = vmul.f32 %v412_v28, %v1490_v8  ;;  %v462_v52 = vmul.f32 %v458_v13, %v412_v28 }
 0x2ce   :  { %v491_v12 = vmul.f32 %v484_v29, %v465_v40  ;;  %v413_v13 = vmul.f32 %v397_v45, %v1488_v7 }
 0x2cf   :  { %v463_v5 = vadd.f32 %v459_v22, %v1488_v7  ;;  %v427_v62 = vsel %vm77_vm0, %v416_v47, 0.0  ;;  %v533_v53 = vsub.f32 %v1507_v15, %v521_v46  ;;  %v466_v6 = vadd.f32 %v462_v52, %v1490_v8 }
 0x2d0   :  { %v428_v60 = vadd.f32 %v427_v62, %v426_v2  ;;  %v560_v55 = vpop.permute.xlu0 %559  ;;  %v488_v10 = vpop.permute.xlu1 %487  ;;  %v502_v21 = vsel %vm77_vm0, %v491_v12, 0.0  ;;  %v417_v52 = vsel %vm77_vm0, %v413_v13, 0.0 }
 0x2d1   :  { %v537_v61 = vmul.f32 %v533_v53, %v484_v29  ;;  %v519_v3 = vmul.f32 %v1513_v17, %v463_v5  ;;  %v492_v1 = vmul.f32 %v488_v10, %v466_v6  ;;  %v522_v11 = vmul.f32 %v1483_v4, %v466_v6 }
 0x2d2   :  { %v429_v59 = vrot.slane %v428_v60, 4 }
 0x2d3   :  { %v541_v14 = vadd.f32 %v537_v61, %v465_v40  ;;  %v531_v18 = vsub.f32 %v1525_v24, %v519_v3  ;;  %v503_v8 = vsel %vm77_vm0, %v492_v1, 0.0  ;;  %v534_v30 = vsub.f32 %v1507_v15, %v522_v11 }
 0x2d4   :  { %v430_v20 = vadd.f32 %v429_v59, %v428_v60  ;;  %v473_v31 = vpop.permute.xlu0 %472  ;;  %v401_v29 = vpop.permute.xlu1 %400  ;;  %v504_v28 = vadd.f32 %v503_v8, %v502_v21 }
 0x2d5   :  { %v597_v33 = vmul.f32 %v1510_v16, %v541_v14  ;;  %v567_v46 = vmul.f32 %v560_v55, %v541_v14  ;;  %v538_v22 = vmul.f32 %v534_v30, %v488_v10  ;;  %v535_v4 = vmul.f32 %v531_v18, %v473_v31 }
 0x2d6   :  { %v414_v7 = vmul.f32 %v401_v29, %v1515_v19  ;;  %v431_v40 = vrot.slane %v430_v20, 2  ;;  %v505_v47 = vrot.slane %v504_v28, 4  ;;  %v489_v61 = vmul.f32 %v473_v31, %v463_v5 }
 0x2d7   :  { %v609_v45 = vsub.f32 %v1522_v23, %v597_v33  ;;  %v542_v2 = vadd.f32 %v538_v22, %v466_v6  ;;  %v539_v62 = vadd.f32 %v535_v4, %v463_v5  ;;  %v460_v10 = vmul.f32 %v456_v34, %v401_v29 }
 0x2d8   :  { %v418_v15 = vsel %vm77_vm0, %v414_v7, 0.0  ;;  %v636_v53 = vpop.permute.xlu0 %635  ;;  %v564_v60 = vpop.permute.xlu1 %563  ;;  %v578_v59 = vsel %vm77_vm0, %v567_v46, 0.0  ;;  %v1657_v6 = vadd.f32 %v431_v40, %v430_v20  ;;  %v506_v21 = vadd.f32 %v505_v47, %v504_v28 }
 0x2d9   :  { %v613_v12 = vmul.f32 %v609_v45, %v560_v55  ;;  %v419_v3 = vadd.f32 %v418_v15, %v417_v52  ;;  %v568_v1 = vmul.f32 %v564_v60, %v542_v2  ;;  %v598_v11 = vmul.f32 %v1510_v16, %v542_v2 }
 0x2da   :  { %v595_v13 = vmul.f32 %v1534_v27, %v539_v62  ;;  %v464_v55 = vadd.f32 %v460_v10, %v1515_v19  ;;  %v493_v20 = vsel %vm77_vm0, %v489_v61, 0.0  ;;  %v507_v7 = vrot.slane %v506_v21, 2 }
 0x2db   :  { %v617_v18 = vadd.f32 %v613_v12, %v541_v14  ;;  %v420_v8 = vrot.slane %v419_v3, 4  ;;  %v579_v5 = vsel %vm77_vm0, %v568_v1, 0.0  ;;  %v610_v30 = vsub.f32 %v1522_v23, %v598_v11 }
 0x2dc   :  { %v549_v9 = vpop.permute.xlu0 %548  ;;  %v607_v25 = vsub.f32 %v1549_v36, %v595_v13  ;;  %v477_v34 = vpop.permute.xlu1 %476  ;;  %v580_v33 = vadd.f32 %v579_v5, %v578_v59  ;;  %v433_v23 = vrot.slane %v1657_v6, 1  ;;  %v520_v10 = vmul.f32 %v1513_v17, %v464_v55 }
 0x2dd   :  { %v421_v31 = vadd.f32 %v420_v8, %v419_v3  ;;  %v643_v29 = vmul.f32 %v636_v53, %v617_v18  ;;  %v673_v16 = vmul.f32 %v1531_v26, %v617_v18  ;;  %v614_v14 = vmul.f32 %v610_v30, %v564_v60 }
 0x2de   :  { %v611_v28 = vmul.f32 %v607_v25, %v549_v9  ;;  %v490_v46 = vmul.f32 %v477_v34, %v464_v55  ;;  %v581_v22 = vrot.slane %v580_v33, 4  ;;  %v565_v4 = vmul.f32 %v549_v9, %v539_v62 }
 0x2df   :  { %v685_v19 = vsub.f32 %v1546_v35, %v673_v16  ;;  %v618_v40 = vadd.f32 %v614_v14, %v542_v2  ;;  %v422_v12 = vrot.slane %v421_v31, 2  ;;  %v654_v3 = vsel %vm77_vm0, %v643_v29, 0.0 }
 0x2e0   :  { %v615_v45 = vadd.f32 %v611_v28, %v539_v62  ;;  %v494_v47 = vsel %vm77_vm0, %v490_v46, 0.0  ;;  %v712_v52 = vpop.permute.xlu0 %711  ;;  %v640_v15 = vpop.permute.xlu1 %639  ;;  %v1672_v8 = vadd.f32 %v581_v22, %v580_v33  ;;  %v569_v2 = vsel %vm77_vm0, %v565_v4, 0.0 }
 0x2e1   :  { %v689_v61 = vmul.f32 %v685_v19, %v636_v53  ;;  %v495_v60 = vadd.f32 %v494_v47, %v493_v20  ;;  %v644_v59 = vmul.f32 %v640_v15, %v618_v40  ;;  %v674_v1 = vmul.f32 %v1531_v26, %v618_v40 }
 0x2e2   :  { %v671_v11 = vmul.f32 %v1555_v37, %v615_v45  ;;  %v532_v5 = vsub.f32 %v1525_v24, %v520_v10  ;;  %v1680_v33 = vadd.f32 %v422_v12, %v421_v31  ;;  %v508_v22 = vadd.f32 %v507_v7, %v506_v21 }
 0x2e3   :  { %v693_v13 = vadd.f32 %v689_v61, %v617_v18  ;;  %v496_v62 = vrot.slane %v495_v60, 4  ;;  %v655_v30 = vsel %vm77_vm0, %v644_v59, 0.0  ;;  %v686_v53 = vsub.f32 %v1546_v35, %v674_v1 }
 0x2e4   :  { %v625_v9 = vpop.permute.xlu0 %624  ;;  %v683_v17 = vsub.f32 %v1568_v42, %v671_v11  ;;  %v553_v25 = vpop.permute.xlu1 %552  ;;  %v656_v18 = vadd.f32 %v655_v30, %v654_v3  ;;  %v536_v20 = vmul.f32 %v532_v5, %v477_v34  ;;  %v583_v35 = vrot.slane %v1672_v8, 2 }
 0x2e5   :  { %v497_v29 = vadd.f32 %v496_v62, %v495_v60  ;;  %v719_v26 = vmul.f32 %v712_v52, %v693_v13  ;;  %v749_v16 = vmul.f32 %v1552_v32, %v693_v13  ;;  %v690_v14 = vmul.f32 %v686_v53, %v640_v15 }
 0x2e6   :  { %v687_v28 = vmul.f32 %v683_v17, %v625_v9  ;;  %v641_v19 = vmul.f32 %v625_v9, %v615_v45  ;;  %v540_v4 = vadd.f32 %v536_v20, %v464_v55  ;;  %v657_v31 = vrot.slane %v656_v18, 4 }
 0x2e7   :  { %v498_v46 = vrot.slane %v497_v29, 2  ;;  %v761_v24 = vsub.f32 %v1565_v41, %v749_v16  ;;  %v694_v47 = vadd.f32 %v690_v14, %v618_v40  ;;  %v730_v59 = vsel %vm77_vm0, %v719_v26, 0.0 }
 0x2e8   :  { %v691_v61 = vadd.f32 %v687_v28, %v615_v45  ;;  %v788_v60 = vpop.permute.xlu0 %787  ;;  %v716_v10 = vpop.permute.xlu1 %715  ;;  %v566_v34 = vmul.f32 %v553_v25, %v540_v4  ;;  %v596_v15 = vmul.f32 %v1534_v27, %v540_v4  ;;  %v645_v21 = vsel %vm77_vm0, %v641_v19, 0.0 }
 0x2e9   :  { %v765_v3 = vmul.f32 %v761_v24, %v712_v52  ;;  %v499_v12 = vadd.f32 %v498_v46, %v497_v29  ;;  %v720_v1 = vmul.f32 %v716_v10, %v694_v47  ;;  %v750_v11 = vmul.f32 %v1552_v32, %v694_v47 }
 0x2ea   :  { %v747_v55 = vmul.f32 %v1561_v39, %v691_v61  ;;  %v509_v7 = vrot.slane %v508_v22, 1  ;;  %v570_v40 = vsel %vm77_vm0, %v566_v34, 0.0  ;;  %v608_v45 = vsub.f32 %v1549_v36, %v596_v15 }
 0x2eb   :  { %v769_v62 = vadd.f32 %v765_v3, %v693_v13  ;;  %v731_v52 = vsel %vm77_vm0, %v720_v1, 0.0  ;;  %v762_v5 = vsub.f32 %v1565_v41, %v750_v11  ;;  %v571_v53 = vadd.f32 %v570_v40, %v569_v2 }
 0x2ec   :  { %v701_v30 = vpop.permute.xlu0 %700  ;;  %v629_v27 = vpop.permute.xlu1 %628  ;;  %v732_v13 = vadd.f32 %v731_v52, %v730_v59  ;;  %v500_v9 = vrot.slane %v499_v12, 1  ;;  %v612_v17 = vmul.f32 %v608_v45, %v553_v25  ;;  %v759_v16 = vsub.f32 %v1574_v44, %v747_v55 }
 0x2ed   :  { %v825_v32 = vmul.f32 %v1558_v38, %v769_v62  ;;  %v766_v29 = vmul.f32 %v762_v5, %v716_v10  ;;  %v717_v26 = vmul.f32 %v701_v30, %v691_v61  ;;  %v1695_v20 = vadd.f32 %v657_v31, %v656_v18 }
 0x2ee   :  { %v572_v14 = vrot.slane %v571_v53, 4  ;;  %v733_v28 = vrot.slane %v732_v13, 4  ;;  %v616_v46 = vadd.f32 %v612_v17, %v540_v4  ;;  %v795_v41 = vmul.f32 %v788_v60, %v769_v62 }
 0x2ef   :  { %v837_v36 = vsub.f32 %v1571_v43, %v825_v32  ;;  %v770_v24 = vadd.f32 %v766_v29, %v694_v47  ;;  %v763_v19 = vmul.f32 %v759_v16, %v701_v30  ;;  %v501_v25 = vadd.f32 %v500_v9, %v499_v12 }
 0x2f0   :  { %v864_v2 = vpop.permute.xlu0 %863  ;;  %v792_v3 = vpop.permute.xlu1 %791  ;;  %v573_v34 = vadd.f32 %v572_v14, %v571_v53  ;;  %v734_v15 = vadd.f32 %v733_v28, %v732_v13  ;;  %v642_v1 = vmul.f32 %v629_v27, %v616_v46  ;;  %v672_v11 = vmul.f32 %v1555_v37, %v616_v46 }
 0x2f1   :  { %v841_v59 = vmul.f32 %v837_v36, %v788_v60  ;;  %v767_v10 = vadd.f32 %v763_v19, %v691_v61  ;;  %v510_v18 = vadd.f32 %v509_v7, %v508_v22  ;;  %v659_v31 = vrot.slane %v1695_v20, 2 }
 0x2f2   :  { %v735_v40 = vrot.slane %v734_v15, 2  ;;  %v796_v45 = vmul.f32 %v792_v3, %v770_v24  ;;  %v646_v4 = vsel %vm77_vm0, %v642_v1, 0.0  ;;  %v684_v47 = vsub.f32 %v1568_v42, %v672_v11 }
 0x2f3   :  { %v845_v55 = vadd.f32 %v841_v59, %v769_v62  ;;  %v1010_v52 = vsel %vm1005_vm2, %v510_v18, %v501_v25  ;;  %v826_v60 = vmul.f32 %v1558_v38, %v770_v24  ;;  %v574_v61 = vrot.slane %v573_v34, 2 }
 0x2f4   :  { %v777_v5 = vpop.permute.xlu0 %776  ;;  %v705_v12 = vpop.permute.xlu1 %704  ;;  %v806_v30 = vsel %vm77_vm0, %v795_v41, 0.0  ;;  %v647_v37 = vadd.f32 %v646_v4, %v645_v21  ;;  %1011 = vrot.lane.b32.xlu0 %v1010_v52, %s1298_s5  ;;  %v721_v62 = vsel %vm77_vm0, %v717_v26, 0.0  ;;  %v688_v7 = vmul.f32 %v684_v47, %v629_v27 }
 0x2f5   :  { %v901_v22 = vmul.f32 %v1580_v48, %v845_v55  ;;  %v807_v42 = vsel %vm77_vm0, %v796_v45, 0.0  ;;  %v838_v53 = vsub.f32 %v1571_v43, %v826_v60  ;;  %v871_v38 = vmul.f32 %v864_v2, %v845_v55 }
 0x2f6   :  { %v648_v32 = vrot.slane %v647_v37, 4  ;;  %v808_v9 = vadd.f32 %v807_v42, %v806_v30  ;;  %v1711_v17 = vadd.f32 %v735_v40, %v734_v15  ;;  %v692_v21 = vadd.f32 %v688_v7, %v616_v46 }
 0x2f7   :  { %v913_v13 = vsub.f32 %v1586_v50, %v901_v22  ;;  %v842_v29 = vmul.f32 %v838_v53, %v792_v3  ;;  %v823_v16 = vmul.f32 %v1583_v49, %v767_v10  ;;  %v793_v27 = vmul.f32 %v777_v5, %v767_v10 }
 0x2f8   :  { %v853_v14 = vpop.permute.xlu0 %852  ;;  %v868_v36 = vpop.permute.xlu1 %867  ;;  %v649_v28 = vadd.f32 %v648_v32, %v647_v37  ;;  %v575_v41 = vadd.f32 %v574_v61, %v573_v34  ;;  %v718_v59 = vmul.f32 %v705_v12, %v692_v21  ;;  %v748_v25 = vmul.f32 %v1561_v39, %v692_v21 }
 0x2f9   :  { %v917_v26 = vmul.f32 %v913_v13, %v864_v2  ;;  %v846_v19 = vadd.f32 %v842_v29, %v770_v24  ;;  %v835_v43 = vsub.f32 %v1589_v51, %v823_v16  ;;  %v882_v15 = vsel %vm77_vm0, %v871_v38, 0.0 }
 0x2fa   :  { %v650_v1 = vrot.slane %v649_v28, 2  ;;  %v576_v46 = vrot.slane %v575_v41, 1  ;;  %v722_v18 = vsel %vm77_vm0, %v718_v59, 0.0  ;;  %v760_v40 = vsub.f32 %v1574_v44, %v748_v25 }
 0x2fb   :  { %v1717_v11 = vadd.f32 %v917_v26, %v845_v55  ;;  %v839_v3 = vmul.f32 %v835_v43, %v777_v5  ;;  %v584_v24 = vadd.f32 %v583_v35, %v1672_v8  ;;  %v809_v34 = vrot.slane %v808_v9, 4 }
 0x2fc   :  { %v781_v2 = vpop.permute.xlu1 %780  ;;  %v723_v45 = vadd.f32 %v722_v18, %v721_v62  ;;  %v577_v4 = vadd.f32 %v576_v46, %v575_v41  ;;  %v872_v39 = vmul.f32 %v868_v36, %v846_v19  ;;  %v1724_v47 = vpop.permute.xlu0 %928  ;;  %v764_v55 = vmul.f32 %v760_v40, %v705_v12 }
 0x2fd   :  { %v843_v52 = vadd.f32 %v839_v3, %v767_v10  ;;  %v585_v60 = vrot.slane %v584_v24, 1  ;;  %v902_v5 = vmul.f32 %v1580_v48, %v846_v19  ;;  %v797_v61 = vsel %vm77_vm0, %v793_v27, 0.0 }
 0x2fe   :  { %v724_v30 = vrot.slane %v723_v45, 4  ;;  %v883_v44 = vsel %vm77_vm0, %v872_v39, 0.0  ;;  %v651_v37 = vadd.f32 %v650_v1, %v649_v28  ;;  %v768_v22 = vadd.f32 %v764_v55, %v692_v21 }
 0x2ff   :  { %v586_v8 = vadd.f32 %v585_v60, %v584_v24  ;;  %v899_v35 = vmul.f32 %v1594_v56, %v843_v52  ;;  %v660_v62 = vadd.f32 %v659_v31, %v1695_v20  ;;  %v810_v10 = vadd.f32 %v809_v34, %v808_v9 }
 0x300   :  { %v1733_v7 = vpop.permute.xlu1 %856  ;;  %v884_v12 = vadd.f32 %v883_v44, %v882_v15  ;;  %v914_v48 = vsub.f32 %v1586_v50, %v902_v5  ;;  %v652_v42 = vrot.slane %v651_v37, 1  ;;  %v869_v32 = vmul.f32 %v853_v14, %v843_v52  ;;  %v940_v31 = vpop.permute.xlu0 %939 }
 0x301   :  { %v1016_v53 = vsel %vm1005_vm2, %v586_v8, %v577_v4  ;;  %v911_v38 = vsub.f32 %v1604_v63, %v899_v35  ;;  %v794_v13 = vmul.f32 %v781_v2, %v768_v22  ;;  %v725_v21 = vadd.f32 %v724_v30, %v723_v45 }
 0x302   :  { %1017 = vrot.lane.b32.xlu0 %v1016_v53, %s1299_s7  ;;  %v885_v29 = vrot.slane %v884_v12, 4  ;;  %v918_v16 = vmul.f32 %v914_v48, %v868_v36  ;;  %v824_v20 = vmul.f32 %v1583_v49, %v768_v22  ;;  %v653_v50 = vadd.f32 %v652_v42, %v651_v37 }
 0x303   :  { %v915_v9 = vmul.f32 %v911_v38, %v853_v14  ;;  %v798_v28 = vsel %vm77_vm0, %v794_v13, 0.0  ;;  %v661_v26 = vrot.slane %v660_v62, 1  ;;  %v811_v41 = vrot.slane %v810_v10, 2 }
 0x304   :  { %v1741_v27 = vpop.permute.xlu1 %932  ;;  %v886_v43 = vadd.f32 %v885_v29, %v884_v12  ;;  %v922_v59 = vadd.f32 %v918_v16, %v846_v19  ;;  %v799_v25 = vadd.f32 %v798_v28, %v797_v61  ;;  %v836_v15 = vsub.f32 %v1589_v51, %v824_v20 }
 0x305   :  { %v919_v1 = vadd.f32 %v915_v9, %v843_v52  ;;  %v662_v46 = vadd.f32 %v661_v26, %v660_v62  ;;  %v947_v36 = vmul.f32 %v940_v31, %v1717_v11  ;;  %v873_v49 = vsel %vm77_vm0, %v869_v32, 0.0 }
 0x306   :  { %v800_v3 = vrot.slane %v799_v25, 4  ;;  %v977_v14 = vmul.f32 %v1600_v58, %v1717_v11  ;;  %v978_v18 = vmul.f32 %v1600_v58, %v922_v59  ;;  %v726_v40 = vrot.slane %v725_v21, 2 }
 0x307   :  { %v975_v24 = vmul.f32 %v1597_v57, %v919_v1  ;;  %v840_v34 = vmul.f32 %v836_v15, %v781_v2  ;;  %v1022_v19 = vsel %vm1005_vm2, %v662_v46, %v653_v50  ;;  %v887_v4 = vrot.slane %v886_v43, 2 }
 0x308   :  { %v944_v45 = vpop.permute.xlu1 %943  ;;  %v801_v51 = vadd.f32 %v800_v3, %v799_v25  ;;  %1023 = vrot.lane.b32.xlu0 %v1022_v19, %s1300_s21  ;;  %v989_v39 = vsub.f32 %v1610_v54, %v977_v14  ;;  %v958_v58 = vsel %vm77_vm0, %v947_v36, 0.0  ;;  %v990_v5 = vsub.f32 %v1610_v54, %v978_v18 }
 0x309   :  { %v948_v52 = vmul.f32 %v944_v45, %v922_v59  ;;  %v987_v55 = vsub.f32 %v1607_v0, %v975_v24  ;;  %v844_v60 = vadd.f32 %v840_v34, %v768_v22  ;;  %v812_v44 = vadd.f32 %v811_v41, %v810_v10 }
 0x30a   :  { %v802_v61 = vrot.slane %v801_v51, 2  ;;  %v993_v2 = vmul.f32 %v989_v39, %v940_v31  ;;  %v994_v48 = vmul.f32 %v990_v5, %v944_v45  ;;  %v727_v13 = vadd.f32 %v726_v40, %v725_v21 }
 0x30b   :  { %v959_v30 = vsel %vm77_vm0, %v948_v52, 0.0  ;;  %v991_v37 = vmul.f32 %v987_v55, %v1724_v47  ;;  %v870_v8 = vmul.f32 %v1733_v7, %v844_v60  ;;  %v900_v35 = vmul.f32 %v1594_v56, %v844_v60 }
 0x30c   :  { %v960_v62 = vadd.f32 %v959_v30, %v958_v58  ;;  %v997_v12 = vadd.f32 %v993_v2, %v1717_v11  ;;  %v803_v22 = vadd.f32 %v802_v61, %v801_v51  ;;  %v813_v42 = vrot.slane %v812_v44, 1 }
 0x30d   :  { %v995_v53 = vadd.f32 %v991_v37, %v919_v1  ;;  %v874_v54 = vsel %vm77_vm0, %v870_v8, 0.0  ;;  %v912_v32 = vsub.f32 %v1604_v63, %v900_v35  ;;  %v998_v29 = vadd.f32 %v994_v48, %v922_v59 }
 0x30e   :  { %v961_v38 = vrot.slane %v960_v62, 4  ;;  %1001 = vst.msk [vmem:[#allocation2 + $0x10] sm:$0xff] %vm77_vm0, %v997_v12  ;;  %v875_v10 = vadd.f32 %v874_v54, %v873_v49  ;;  %v804_v16 = vrot.slane %v803_v22, 1  ;;  %v424_v20 = vrot.slane %v1680_v33, 1 }
 0x30f   :  { %999 = vst.msk [vmem:[#allocation2] sm:$0xff] %vm77_vm0, %v995_v53  ;;  %v916_v56 = vmul.f32 %v912_v32, %v1733_v7  ;;  %1002 = vst.msk [vmem:[#allocation2 + $0x18] sm:$0xff] %vm77_vm0, %v998_v29  ;;  %v814_v28 = vadd.f32 %v813_v42, %v812_v44  ;;  %v434_v63 = vadd.f32 %v433_v23, %v1657_v6  ;;  %v737_v25 = vrot.slane %v1711_v17, 1 }
 0x310   :  { %v962_v11 = vadd.f32 %v961_v38, %v960_v62  ;;  %v876_v31 = vrot.slane %v875_v10, 4  ;;  %v805_v9 = vadd.f32 %v804_v16, %v803_v22  ;;  %v945_v21 = vmul.f32 %v1724_v47, %v919_v1 }
 0x311   :  { %v920_v50 = vadd.f32 %v916_v56, %v844_v60  ;;  %v888_v26 = vadd.f32 %v887_v4, %v886_v43  ;;  %v425_v41 = vadd.f32 %v424_v20, %v1680_v33  ;;  %v728_v15 = vrot.slane %v727_v13, 1 }
 0x312   :  { %v877_v59 = vadd.f32 %v876_v31, %v875_v10  ;;  %v1032_v7 = vsel %vm1005_vm2, %v814_v28, %v805_v9  ;;  %v963_v49 = vrot.slane %v962_v11, 2  ;;  %v738_v47 = vadd.f32 %v737_v25, %v1711_v17 }
 0x313   :  { %v946_v46 = vmul.f32 %v1741_v27, %v920_v50  ;;  %v976_v36 = vmul.f32 %v1597_v57, %v920_v50  ;;  %1033 = vrot.lane.b32.xlu1 %v1032_v7, %s1298_s5  ;;  %v1006_v23 = vsel %vm1005_vm2, %v434_v63, %v425_v41  ;;  %v729_v43 = vadd.f32 %v728_v15, %v727_v13 }
 0x314   :  { %v878_v6 = vrot.slane %v877_v59, 2  ;;  %v949_v33 = vsel %vm77_vm0, %v945_v21, 0.0  ;;  %v889_v40 = vrot.slane %v888_v26, 1  ;;  %v964_v45 = vadd.f32 %v963_v49, %v962_v11 }
 0x315   :  { %v950_v1 = vsel %vm77_vm0, %v946_v46, 0.0  ;;  %v988_v3 = vsub.f32 %v1607_v0, %v976_v36  ;;  %v1028_v57 = vsel %vm1005_vm2, %v738_v47, %v729_v43 }
 0x316   :  { %v951_v14 = vadd.f32 %v950_v1, %v949_v33  ;;  %v879_v18 = vadd.f32 %v878_v6, %v877_v59  ;;  %v890_v39 = vadd.f32 %v889_v40, %v888_v26  ;;  %v965_v0 = vrot.slane %v964_v45, 1 }
 0x317   :  { %v992_v24 = vmul.f32 %v988_v3, %v1741_v27 }
 0x318   :  { %v952_v34 = vrot.slane %v951_v14, 4  ;;  %v880_v19 = vrot.slane %v879_v18, 1  ;;  %v966_v5 = vadd.f32 %v965_v0, %v964_v45 }
 0x319   :  { %v996_v4 = vadd.f32 %v992_v24, %v920_v50 }
 0x31a   :  { %v953_v51 = vadd.f32 %v952_v34, %v951_v14  ;;  %v881_v17 = vadd.f32 %v880_v19, %v879_v18 }
 0x31b   :  { %1000 = vst.msk [vmem:[#allocation2 + $0x8] sm:$0xff] %vm77_vm0, %v996_v4 }
 0x31c   :  { %v954_v52 = vrot.slane %v953_v51, 2  ;;  %v1038_v55 = vsel %vm1005_vm2, %v890_v39, %v881_v17 }
 0x31d   :  { %1039 = vrot.lane.b32.xlu1 %v1038_v55, %s1299_s7 }
 0x31e   :  { %v955_v60 = vadd.f32 %v954_v52, %v953_v51 }
 0x320   :  { %v956_v58 = vrot.slane %v955_v60, 1 }
 0x322   :  { %v957_v61 = vadd.f32 %v956_v58, %v955_v60 }
 0x324   :  { %v1044_v27 = vsel %vm1005_vm2, %v966_v5, %v957_v61 }
 0x325   :  { %1045 = vrot.lane.b32.xlu1 %v1044_v27, %s1300_s21 }
 0x366   :  { %v1012_v2 = vpop.permute.xlu0 %1011 }
 0x367   :  { %v1048_v35 = vsel %vm77_vm0, %v1006_v23, %v1012_v2 }
 0x374   :  { %v1018_v44 = vpop.permute.xlu0 %1017 }
 0x375   :  { %v1050_v12 = vsel %vm1049_vm3, %v1048_v35, %v1018_v44 }
 0x37a   :  { %v1024_v8 = vpop.permute.xlu0 %1023 }
 0x37b   :  { %v1052_v42 = vsel %vm1051_vm4, %v1050_v12, %v1024_v8 }
 0x385   :  { %v1034_v30 = vpop.permute.xlu1 %1033 }
 0x386   :  { %v1053_v62 = vsel %vm77_vm0, %v1028_v57, %v1034_v30 }
 0x38f   :  { %v1040_v37 = vpop.permute.xlu1 %1039 }
 0x390   :  { %v1054_v48 = vsel %vm1049_vm3, %v1053_v62, %v1040_v37 }
 0x397   :  { %v1046_v22 = vpop.permute.xlu1 %1045 }
 0x398   :  { %v1055_v53 = vsel %vm1051_vm4, %v1054_v48, %v1046_v22 }
 0x399   :  { %v1058_v54 = vcombine.low %v1052_v42, %v1055_v53 }
 0x39b   :  { %1094 = vst.sshfl [vmem:[#allocation9] sm:$0x33 pattern:$0x76325410] %v1058_v54 }
 0x39c   :  { %1276 = shalt.err (!%p1273_p0)
}
 0x39d   :  { %s1277_s27 = scalar_lea.hbm %s1812_s8, 64 }
 0x39e   :  { %p1278_p1 = scmp.ne.s32.totalorder %s1812_s8, %s1277_s27  ;;  %p1281_p2 = scmp.lt.u32.totalorder %s1277_s27, %s1812_s8 }
 0x3a0   :  { %p1283_p3 = pnand %p1281_p2, %p1278_p1 }
 0x3a2   :  { %1286 = shalt.err (!%p1283_p3)
}
 0x3a3   :  { %1077 = dma.vmem_to_hbm [thread:$0]  %s1075_s23, 64, %s1812_s8, [#allocation5]  }
 0x3a4   :  { %1291 = dma.done.wait [#allocation5], 64  }
 0x3a5   :  { %1292 = vsyncadd [#allocation5], 4294967232 }
 0x3a6   :  { %1081 = vsyncpa [#allocation4], 1 }
 0x3a7   :  { %1082 = vsyncpa [#allocation7], 1 }
 0x3a8   :  { %1083 = vsyncpa [#allocation5], 1 }

</bundles_post_ra>
